<compile_context>
chip_gen: v7x
topology: tpu7x:2x2x1
jax: 0.10.0
libtpu: 0.0.40
codegen_flags: <defaults>
</compile_context>

<pallas_src>
import jax
import jax.numpy as jnp
import numpy as np
from jax import lax
from jax.experimental import pallas as pl
from jax.experimental.pallas import tpu as pltpu


def _round_up(v, m):
    return (v + m - 1) // m * m


def _divisors(n):
    return [d for d in range(1, n + 1) if n % d == 0]


def _tpu_vmem_capacity():
    try:
        info = pltpu.get_tpu_info()
        cap = int(getattr(info, "vmem_capacity_bytes", 0) or 0)
        if cap > 0:
            return cap
    except Exception:
        pass
    return 64 * 1024 * 1024  # conservative default (v7x per-TC VMEM)


def _matmul_bias_kernel(bd_ref, bias_ref, x_ref, out_ref):
    """out = block_diag(wz) @ x + bias ; f32 accumulate, cast only at the store."""
    acc = jnp.dot(bd_ref[...], x_ref[...], preferred_element_type=jnp.float32)
    out_ref[...] = (acc + bias_ref[...]).astype(out_ref.dtype)


def hierarchy_point_neck(kernel, search, params, *,
                         compute_dtype=jnp.bfloat16,
                         out_dtype=jnp.float32):
    """kernel: (B, C, Hz, Wz), search: (B, C, H, W) NCHW  ->  (B, Cadj, H, W) out_dtype.

    compute_dtype : dtype the search slab is streamed in (bf16 halves the x read);
                    the spatial mean / MLP / gate / matmul accumulation stay f32.
    out_dtype     : dtype of the stored output (bf16 halves the dominant HBM stream
                    whenever 4*Cadj > 2*C; downstream must tolerate it).
    """
    # TODO(synk): only hierarchy=1 is implemented; for hierarchy>1 the reference loop
    # mixes channel counts in a way that is only well-defined when C == 2*Hz*Wz.
    b, c, hz, wz_ = kernel.shape
    _, _, h, w = search.shape
    kz = hz * wz_
    hw = h * w

    w1, b1, w2, b2, wadj, badj = params
    cadj = wadj.shape[0]

    compute_dtype = jnp.dtype(compute_dtype)
    out_dtype = jnp.dtype(out_dtype)
    cbytes = compute_dtype.itemsize
    obytes = out_dtype.itemsize

    # ---------------- generation-aware sizing ----------------
    cap = _tpu_vmem_capacity()
    if cap >= 100 * 1024 * 1024:          # v5e / v6e: 128 MiB VMEM -> big blocks
        vmem_limit = 64 * 1024 * 1024
        budget = 40 * 1024 * 1024
        hw_tile_cap = 2048
    else:                                  # v7x: 64 MiB / TC -> conservative
        vmem_limit = 28 * 1024 * 1024
        budget = 18 * 1024 * 1024
        hw_tile_cap = 1024

    def layout_ok(bt_):
        # second-to-last block dims must be a multiple of 8 or span the full array dim
        nb_ = b // bt_
        return nb_ == 1 or ((bt_ * c) % 8 == 0 and (bt_ * cadj) % 8 == 0)

    def resident_bytes(bt_, hwt_):
        x_blk = bt_ * c * hwt_ * cbytes
        o_blk = bt_ * cadj * hwt_ * obytes
        bd_blk = bt_ * cadj * bt_ * c * cbytes
        bias_blk = bt_ * cadj * 4
        acc_tmp = bt_ * cadj * hwt_ * 4          # f32 matmul result before the final cast
        return 2 * (x_blk + o_blk + bd_blk + bias_blk) + acc_tmp   # 2 = double buffering

    # Spatial lane tile: multiple of 128, as large as the budget allows.
    hw_tile = min(_round_up(hw, 128), hw_tile_cap)
    while hw_tile > 128 and resident_bytes(1, hw_tile) > budget:
        hw_tile -= 128

    # Batch block: largest divisor of B that is layout-legal and fits the budget.
    cands = [d for d in _divisors(b) if layout_ok(d)]          # always contains B
    fitting = [d for d in cands if resident_bytes(d, hw_tile) <= budget]
    bt = max(fitting) if fitting else min(cands)

    nb = b // bt
    nh = -(-hw // hw_tile)

    # Guarantee >= 2 grid steps along a "parallel" axis (keeps both v7x TCs busy).
    if nb * nh < 2:
        if hw > 128:
            hw_tile = _round_up(-(-hw // 2), 128)
            nh = -(-hw // hw_tile)
        elif bt > 1:
            smaller = [d for d in cands if d < bt]
            if smaller:
                bt = max(smaller)
                nb = b // bt

    vmem_limit = int(max(vmem_limit, resident_bytes(bt, hw_tile) + (4 << 20)))

    # ---------------- flatten to 2-D lane-dense slabs (free reshapes of NCHW) ----------------
    x2d = search.reshape(b * c, hw)
    needs_cast = x2d.dtype != compute_dtype

    if needs_cast:
        # Fused prologue: ONE pass over the search slab produces the compute_dtype
        # streaming copy AND the exact-f32 per-(b,c) spatial sums (no extra mean pass,
        # no astype copy, no pad copy).  Ragged HW tail is masked in-kernel for the sum
        # and masked by Pallas partial-block stores for the copy.
        def _prologue_kernel(x_ref, xc_ref, sum_ref):
            hi = pl.program_id(1)
            raw = x_ref[...]
            xf = raw.astype(jnp.float32)
            lane = lax.broadcasted_iota(jnp.int32, xf.shape, 1)
            valid = (hi * hw_tile + lane) < hw

            @pl.when(hi == 0)
            def _():
                sum_ref[...] = jnp.zeros_like(sum_ref)

            sum_ref[...] += jnp.sum(jnp.where(valid, xf, 0.0), axis=1, keepdims=True)
            xc_ref[...] = raw.astype(xc_ref.dtype)

        x_stream, sums = pl.pallas_call(
            _prologue_kernel,
            out_shape=(jax.ShapeDtypeStruct((b * c, hw), compute_dtype),
                       jax.ShapeDtypeStruct((b * c, 1), jnp.float32)),
            grid=(nb, nh),
            in_specs=[pl.BlockSpec((bt * c, hw_tile), lambda bi, hi: (bi, hi))],
            out_specs=(pl.BlockSpec((bt * c, hw_tile), lambda bi, hi: (bi, hi)),
                       pl.BlockSpec((bt * c, 1), lambda bi, hi: (bi, 0))),
            compiler_params=pltpu.CompilerParams(
                dimension_semantics=("parallel", "arbitrary"),
                vmem_limit_bytes=vmem_limit),
        )(x2d)
    else:
        # x already in compute_dtype: stream it directly, let XLA do the single reduce.
        x_stream = x2d
        sums = jnp.sum(x2d.astype(jnp.float32), axis=1, keepdims=True)

    # ---------------- gate + folded 1x1 adjust conv (tiny, hoisted out of the grid) ----------------
    mean_x = sums.reshape(b, c) * (1.0 / float(hw))                                  # (B, C)
    z_mat = kernel.reshape(b, c, kz).astype(jnp.float32)                             # (B, C, Kz)
    s = jnp.einsum('bck,bc->bk', z_mat, mean_x)                                      # (B, Kz)
    w1m = jnp.asarray(w1, jnp.float32).reshape(kz, kz)
    w2m = jnp.asarray(w2, jnp.float32).reshape(kz, kz)
    h1 = jnp.maximum(s @ w1m.T + jnp.asarray(b1, jnp.float32).reshape(1, kz), 0.0)
    a = jax.nn.sigmoid(h1 @ w2m.T + jnp.asarray(b2, jnp.float32).reshape(1, kz))     # (B, Kz)
    wadj_m = jnp.asarray(wadj, jnp.float32).reshape(cadj, kz)
    wz = jnp.einsum('ok,bk,bck->boc', wadj_m, a, z_mat)                              # (B, Cadj, C)

    # Per-batch-block block-diagonal weight so the hot kernel is one dense 2-D matmul
    # (sublane-dense rows even when C is small), plus a matching tiled bias.
    eye = jnp.eye(bt, dtype=jnp.float32)
    bd = jnp.einsum('nioc,ij->niojc', wz.reshape(nb, bt, cadj, c), eye)
    bd = bd.reshape(nb * bt * cadj, bt * c).astype(compute_dtype)
    bias = jnp.tile(jnp.asarray(badj, jnp.float32).reshape(cadj), (bt,)).reshape(bt * cadj, 1)

    # ---------------- main kernel: out = wz @ x + bias, streamed over HW tiles ----------------
    out2d = pl.pallas_call(
        _matmul_bias_kernel,
        out_shape=jax.ShapeDtypeStruct((b * cadj, hw), out_dtype),
        grid=(nb, nh),
        in_specs=[
            pl.BlockSpec((bt * cadj, bt * c), lambda bi, hi: (bi, 0)),   # fused gate*adjust weight
            pl.BlockSpec((bt * cadj, 1), lambda bi, hi: (0, 0)),         # adjust bias (f32)
            pl.BlockSpec((bt * c, hw_tile), lambda bi, hi: (bi, hi)),    # search stream (dominant read)
        ],
        out_specs=pl.BlockSpec((bt * cadj, hw_tile), lambda bi, hi: (bi, hi)),
        compiler_params=pltpu.CompilerParams(
            dimension_semantics=("parallel", "parallel"),
            vmem_limit_bytes=vmem_limit),
    )(bd, bias, x_stream)

    return out2d.reshape(b, cadj, h, w)


def _reference(kernel, search, params):
    """Pure-JAX replica of the PyTorch forward (hierarchy=1, cat=False, adjust=True)."""
    b, c, hz, wz_ = kernel.shape
    _, _, h, w = search.shape
    w1, b1, w2, b2, wadj, badj = params
    kz = hz * wz_
    z_mat = kernel.reshape(b, c, kz).transpose(0, 2, 1)                 # (B, Kz, C)
    x_mat = search.reshape(b, c, h * w)                                 # (B, C, HW)
    corr = jnp.einsum('bkc,bcp->bkp', z_mat, x_mat)                     # (B, Kz, HW)
    s = jnp.mean(corr, axis=2, keepdims=True)                           # (B, Kz, 1)
    h1 = jnp.maximum(jnp.einsum('oi,bip->bop', w1, s) + b1.reshape(1, kz, 1), 0.0)
    a = jax.nn.sigmoid(jnp.einsum('oi,bip->bop', w2, h1) + b2.reshape(1, kz, 1))
    opt = corr * a
    out = jnp.einsum('oi,bip->bop', wadj, opt) + badj.reshape(1, -1, 1)
    return out.reshape(b, wadj.shape[0], h, w)


if __name__ == "__main__":
    def make_inputs(key, b, c, hz, wz_, h, w, cadj):
        kz = hz * wz_
        ks = jax.random.split(key, 8)
        kernel_z = jax.random.normal(ks[0], (b, c, hz, wz_), jnp.float32)
        search_x = jax.random.normal(ks[1], (b, c, h, w), jnp.float32)
        w1 = jax.random.normal(ks[2], (kz, kz), jnp.float32) * 0.1
        b1 = jax.random.normal(ks[3], (kz,), jnp.float32) * 0.1
        w2 = jax.random.normal(ks[4], (kz, kz), jnp.float32) * 0.1
        b2 = jax.random.normal(ks[5], (kz,), jnp.float32) * 0.1
        wadj = jax.random.normal(ks[6], (cadj, kz), jnp.float32) * 0.1
        badj = jax.random.normal(ks[7], (cadj,), jnp.float32) * 0.1
        return kernel_z, search_x, (w1, b1, w2, b2, wadj, badj)

    key = jax.random.PRNGKey(0)
    k_a, k_b = jax.random.split(key)

    # Config A: num_kernel = corr_channel = 16, adj_channel = 32, HW = 256 (lane-dense).
    kz_a, x_a, p_a = make_inputs(k_a, 2, 8, 4, 4, 16, 16, 32)
    ref_a = jax.block_until_ready(_reference(kz_a, x_a, p_a))

    out_f32 = jax.block_until_ready(
        hierarchy_point_neck(kz_a, x_a, p_a,
                             compute_dtype=jnp.float32, out_dtype=jnp.float32))
    assert out_f32.shape == ref_a.shape, out_f32.shape
    np.testing.assert_allclose(np.asarray(out_f32), np.asarray(ref_a), rtol=1e-5, atol=1e-5)

    # bf16 streaming + bf16 output (exercises the fused cast+sum prologue).
    out_bf16 = jax.block_until_ready(
        hierarchy_point_neck(kz_a, x_a, p_a,
                             compute_dtype=jnp.bfloat16, out_dtype=jnp.bfloat16))
    np.testing.assert_allclose(np.asarray(out_bf16.astype(jnp.float32)),
                               np.asarray(ref_a), rtol=5e-2, atol=5e-2)

    # Config B: ragged sizes -> exercises masked partial lane tiles (HW=36) and B=3 blocking.
    kz_b, x_b, p_b = make_inputs(k_b, 3, 8, 4, 4, 6, 6, 32)
    ref_b = jax.block_until_ready(_reference(kz_b, x_b, p_b))
    out_b = jax.block_until_ready(
        hierarchy_point_neck(kz_b, x_b, p_b,
                             compute_dtype=jnp.float32, out_dtype=jnp.float32))
    np.testing.assert_allclose(np.asarray(out_b), np.asarray(ref_b), rtol=1e-5, atol=1e-5)

    out_b16 = jax.block_until_ready(
        hierarchy_point_neck(kz_b, x_b, p_b,
                             compute_dtype=jnp.bfloat16, out_dtype=jnp.bfloat16))
    np.testing.assert_allclose(np.asarray(out_b16.astype(jnp.float32)),
                               np.asarray(ref_b), rtol=5e-2, atol=5e-2)

    print("KERNEL_OK")
</pallas_src>

<mosaic_0001>
module attributes {stable_mosaic.version = 11 : i64} {
  func.func @_matmul_bias_kernel(%arg0: i32, %arg1: i32, %arg2: memref<64x16xf32, #tpu.memory_space<vmem>>, %arg3: memref<64x1xf32, #tpu.memory_space<vmem>>, %arg4: memref<16x128xf32, #tpu.memory_space<vmem>>, %arg5: memref<64x128xf32, #tpu.memory_space<vmem>>) attributes {dimension_semantics = [#tpu.dimension_semantics<parallel>, #tpu.dimension_semantics<parallel>], iteration_bounds = array<i64: 1, 2>, scalar_prefetch = 0 : i64, scratch_operands = 0 : i64, tpu.core_type = #tpu.core_type<tc>, window_params = [{transform_indices = @transform_0, window_bounds = array<i64: 64, 16>}, {pipeline_mode = #tpu.pipeline_mode<synchronous>, transform_indices = @transform_1, window_bounds = array<i64: 64, 1>}, {transform_indices = @transform_2, window_bounds = array<i64: 16, 128>}, {transform_indices = @transform_3, window_bounds = array<i64: 64, 128>}]} {
    %c0 = arith.constant 0 : index
    %c0_0 = arith.constant 0 : index
    %0 = vector.load %arg2[%c0, %c0_0] : memref<64x16xf32, #tpu.memory_space<vmem>>, vector<64x16xf32>
    %c0_1 = arith.constant 0 : index
    %c0_2 = arith.constant 0 : index
    %1 = vector.load %arg4[%c0_1, %c0_2] : memref<16x128xf32, #tpu.memory_space<vmem>>, vector<16x128xf32>
    %cst = arith.constant dense<0.000000e+00> : vector<64x128xf32>
    %2 = tpu.matmul %0, %1, %cst {dimension_numbers = #tpu.dot_dimension_numbers<[1], [0], [0], [1], [0, 0, 1, 1], [], []>} : vector<64x16xf32>, vector<16x128xf32>, vector<64x128xf32> -> vector<64x128xf32>
    %c0_3 = arith.constant 0 : index
    %c0_4 = arith.constant 0 : index
    %3 = vector.load %arg3[%c0_3, %c0_4] : memref<64x1xf32, #tpu.memory_space<vmem>>, vector<64x1xf32>
    %4 = vector.broadcast %3 : vector<64x1xf32> to vector<64x128xf32>
    %5 = arith.addf %2, %4 : vector<64x128xf32>
    %c0_5 = arith.constant 0 : index
    %c0_6 = arith.constant 0 : index
    %6 = vector.load %arg5[%c0_5, %c0_6] : memref<64x128xf32, #tpu.memory_space<vmem>>, vector<64x128xf32>
    tpu.vector_store %arg5[%c0_5, %c0_6], %5 {strides = array<i32>} : memref<64x128xf32, #tpu.memory_space<vmem>>, vector<64x128xf32>,
    return
  }
  func.func @transform_0(%arg0: i32, %arg1: i32) -> (i32, i32) {
    %c0_i32 = arith.constant 0 : i32
    %c0_i32_0 = arith.constant 0 : i32
    return %arg0, %c0_i32 : i32, i32
  }
  func.func @transform_1(%arg0: i32, %arg1: i32) -> (i32, i32) {
    %c0_i32 = arith.constant 0 : i32
    %c0_i32_0 = arith.constant 0 : i32
    %c0_i32_1 = arith.constant 0 : i32
    return %c0_i32, %c0_i32_0 : i32, i32
  }
  func.func @transform_2(%arg0: i32, %arg1: i32) -> (i32, i32) {
    %c0_i32 = arith.constant 0 : i32
    return %arg0, %arg1 : i32, i32
  }
  func.func @transform_3(%arg0: i32, %arg1: i32) -> (i32, i32) {
    %c0_i32 = arith.constant 0 : i32
    return %arg0, %arg1 : i32, i32
  }
}

</mosaic_0001>

<bundles_post_ra>
// kernel: tpu_custom_call.1
= control target key start
LH: loop header
LB: loop body
LE: loop exit
PB: predicated region body
PF: predicated region fallthrough
CT: control target
= control target key end

     0   :  { %8 = vsyncpa [#allocation4], 0  ;;  %s957_s0 = inlined_call_operand.vmem [shape: f32[64,16], index: 0, kind: input, shape index: {}]   ;;  %s958_s1 = inlined_call_operand.vmem [shape: f32[64,1], index: 1, kind: input, shape index: {}]   ;;  %s959_s2 = inlined_call_operand.vmem [shape: f32[16,256], index: 2, kind: input, shape index: {}]   ;;  %s960_s3 = inlined_call_operand.hbm [shape: f32[64,256], index: 3, kind: output, shape index: {}]  }
   0x1   :  { %10 = vsyncpa [#allocation4 + $0x1], 0  ;;  %s777_s12 = smov 0   ;;  %s779_s13 = smov 0  }
   0x2   :  { %s781_s14 = smov 0   ;;  %s783_s15 = smov 0  }
   0x3   :  { %s785_s16 = smov 0   ;;  %s787_s17 = smov 0  }
   0x4 LB: > { %s557_s18 = sadd.s32 4294967295, %s750_s17   ;;  %s558_s19 = sadd.s32 4294967294, %s750_s17   ;;  %s750_s17 = sphi %s787_s17, %s16_s17   ;;  %s746_s16 = sphi %s785_s16, %s967_s16   ;;  %s742_s15 = sphi %s783_s15, %s966_s15   ;;  %s738_s14 = sphi %s781_s14, %s965_s14   ;;  %s734_s13 = sphi %s779_s13, %s964_s13   ;;  %s730_s12 = sphi %s777_s12, %s963_s12  }
   0x5   : > { %s25_s20 = sadd.s32 1, %s746_s16  ;;  %s84_s21 = sadd.s32 1, %s738_s14 }
   0x6   : > { %p26_p0 = scmp.ge.s32.totalorder %s25_s20, 2  ;;  %p91_p1 = scmp.ne.s32.totalorder %s738_s14, %s734_s13 }
   0x7   : > { %p92_p2 = scmp.eq.s32.totalorder %s750_s17, 0  ;;  %p123_p3 = scmp.eq.s32.totalorder %s557_s18, 1 }
   0x8   : > { %s969_s20 = smov (%p26_p0, %s25_s20), 0  ;;  %p128_p6 = scmp.ne.s32.totalorder %s734_s13, %s730_s12 }
   0x9   : > { %p93_p4 = por %p92_p2, %p91_p1  ;;  %p816_p5 = por %p123_p3, %p91_p1 }
   0xa   : > { %s80_s23 = ssub.s32 %s746_s16, %s969_s20  ;;  %p129_p8 = scmp.eq.s32.totalorder %s558_s19, 1 }
   0xb   : > { %p82_p7 = scmp.eq.s32.totalorder %s80_s23, 0  ;;  %p561_p10 = scmp.ge.s32.totalorder %s750_s17, 2 }
   0xc   : > { %p827_p9 = por %p129_p8, %p128_p6 }
   0xd   : > { %s825_s24 = scalar_select %p82_p7, %s738_s14, %s84_s21  }
   0xe   : > { %157 = sbr.rel (%p561_p10) target bundleno = 28 (0x1c), region = 24 }
  0x15   : > { %160 = sbr.rel (!%p93_p4) target bundleno = 28 (0x1c), region = 28  ;;  %s162_s26 = sand.u32 (%p93_p4), 1, %s738_s14  }
  0x16   : > { %s563_s27 = sshll.u32 (%p93_p4), %s746_s16, 3  ;;  %s562_s28 = sshll.u32 (%p93_p4), %s162_s26, 4 }
  0x17   : > { %s169_s4 = scalar_lea.vmem (%p93_p4), %s959_s2, %s563_s27  ;;  %s164_s5 = scalar_lea.vmem (%p93_p4), [#allocation2], %s562_s28 }
  0x18   : > { %v199_v0 = vld [vmem:[%s169_s4] sm:$0xff] (%p93_p4)  ;;  %v201_v1 = vld [vmem:[%s169_s4 + $0x10] sm:$0xff] (%p93_p4) }
  0x19   : > { %200 = vst [vmem:[%s164_s5] sm:$0xff] (%p93_p4), %v199_v0  ;;  %202 = vst [vmem:[%s164_s5 + $0x8] sm:$0xff] (%p93_p4), %v201_v1 }
  0x1c PF: > { %p564_p11 = scmp.ge.s32.totalorder %s750_s17, 1  ;;  %p207_p12 = scmp.lt.s32.totalorder %s750_s17, 3 }
  0x1e   : > { %p208_p13 = pnand %p564_p11, %p207_p12 }
  0x1f   : > { %s842_s6 = sand.u32 (!%p208_p13), 1, %s734_s13   ;;  %v250_v2 = vld [vmem:[%s957_s0] sm:$0xff] (!%p208_p13)  ;;  %vm308_vm0 = vcmask (!%p208_p13), 130048   ;;  %v752_v4 = vmov (!%p208_p13), 0   ;;  %v262_v5 = vld [vmem:[%s958_s1 + $0x10] sm:$0xff] (!%p208_p13)  ;;  %v263_v10 = vld [vmem:[%s958_s1 + $0x18] sm:$0xff] (!%p208_p13) }
  0x20   : > { %211 = sbr.rel (%p208_p13) target bundleno = 276 (0x114), region = 66  ;;  %v254_v3 = vld [vmem:[%s957_s0 + $0x20] sm:$0xff] (!%p208_p13)  ;;  %s565_s11 = sshll.u32 (!%p208_p13), %s842_s6, 4  ;;  %593 = vmatprep.mubr.msk.f32.mxu0 (!%p208_p13), %vm308_vm0, %v250_v2  ;;  %671 = vset.pattern.permute.xlu1 (!%p208_p13), %v752_v4  ;;  %v261_v11 = vld [vmem:[%s958_s1 + $0x8] sm:$0xff] (!%p208_p13)  ;;  %v252_v14 = vld [vmem:[%s957_s0 + $0x10] sm:$0xff] (!%p208_p13) }
  0x21   : > { %599 = vmatprep.mubr.msk.f32.mxu1 (!%p208_p13), %vm308_vm0, %v254_v3  ;;  %670 = vset.pattern.permute.xlu0 (!%p208_p13), %v752_v4  ;;  %s216_s21 = scalar_lea.vmem (!%p208_p13), [#allocation2], %s565_s11  ;;  %v260_v8 = vld [vmem:[%s958_s1] sm:$0xff] (!%p208_p13)  ;;  %v251_v12 = vld [vmem:[%s957_s0 + $0x8] sm:$0xff] (!%p208_p13)  ;;  %v256_v15 = vld [vmem:[%s957_s0 + $0x30] sm:$0xff] (!%p208_p13)  ;;  %s566_s9 = sshll.u32 (!%p208_p13), %s842_s6, 6 }
  0x22   : > { %v258_v6 = vld [vmem:[%s216_s21] sm:$0xff] (!%p208_p13)  ;;  %v259_v7 = vld [vmem:[%s216_s21 + $0x8] sm:$0xff] (!%p208_p13)  ;;  %280 = vperm.xlu1 (!%p208_p13), %671, %v262_v5   ;;  %270 = vperm.xlu0 (!%p208_p13), %670, %v260_v8   ;;  %s241_s10 = scalar_lea.vmem (!%p208_p13), [#allocation3], %s566_s9  ;;  %s576_s18 = sshll.u32 (!%p208_p13), %s742_s15, 7 }
  0x23   : > { %v605_v9 = vpack.c.bf16 (!%p208_p13), %v259_v7, %v258_v6  ;;  %v255_v13 = vld [vmem:[%s957_s0 + $0x28] sm:$0xff] (!%p208_p13)  ;;  %v264_v17 = vld [vmem:[%s958_s1 + $0x20] sm:$0xff] (!%p208_p13)  ;;  %v253_v18 = vld [vmem:[%s957_s0 + $0x18] sm:$0xff] (!%p208_p13)  ;;  %s462_s11 = sshll.u32 (!%p208_p13), %s241_s10, 4  ;;  %s908_s21 = scalar_lea.hbm (!%p208_p13), %s960_s3, %s576_s18  ;;  %s903_s11 = int_to_ptr.vmem [resolvable:$true] %s462_s11 }
  0x24   : > { %v265_v16 = vld [vmem:[%s958_s1 + $0x28] sm:$0xff] (!%p208_p13)  ;;  %v257_v19 = vld [vmem:[%s957_s0 + $0x38] sm:$0xff] (!%p208_p13)  ;;  %v266_v21 = vld [vmem:[%s958_s1 + $0x30] sm:$0xff] (!%p208_p13)  ;;  %s447_s23 = scalar_lea.sflag (!%p208_p13), [#allocation4], %s842_s6  ;;  %s672_s26 = scalar_lea.vmem (!%p208_p13), %s903_s11, 1024 }
  0x25   : > { %606 = vmatprep.subr.bf16.mxu0 (!%p208_p13), %v605_v9  ;;  %609 = vmatprep.subr.bf16.mxu1 (!%p208_p13), %v605_v9  ;;  %v267_v20 = vld [vmem:[%s958_s1 + $0x38] sm:$0xff] (!%p208_p13)  ;;  %p673_p0 = scmp.ne.s32.totalorder (!%p208_p13), %s903_s11, %s672_s26  ;;  %s753_s27 = smov (!%p208_p13), [#allocation3]  }
  0x26   : > { %608 = vmatpush3.bf16.msra.mxu0 (!%p208_p13), %v605_v9  ;;  %610 = vmatpush3.bf16.msra.mxu1 (!%p208_p13), %v605_v9  ;;  %s676_s28 = sshll.u32 (!%p208_p13), %s753_s27, 4  ;;  %s677_s28 = int_to_ptr.vmem [resolvable:$false] %s676_s28 }
  0x27   : > { %285 = vperm.xlu1 %671, %v263_v10   ;;  %275 = vperm.xlu0 %670, %v261_v11   ;;  %p674_p1 = pnand %p673_p0, %p816_p5  ;;  %s678_s29 = scalar_lea.vmem %s677_s28, 2048 }
  0x28   : > { %p679_p3 = scmp.lt.s32.totalorder %s903_s11, %s677_s28  ;;  %p680_p4 = scmp.lt.s32.totalorder %s678_s29, %s672_s26 }
  0x29   : > { %594 = vmatmul.mubr.msk.f32.vlgmr.msra.gmra.mrb[0].mxu0 %vm308_vm0, %v251_v12  ;;  %600 = vmatmul.mubr.msk.f32.vlgmr.msra.gmra.mrb[0].mxu1 %vm308_vm0, %v255_v13  ;;  %p675_p2 = pneg %p674_p1 }
  0x2a   : > { %596 = vmatprep.mubr.msk.f32.mxu0 %vm308_vm0, %v252_v14  ;;  %602 = vmatprep.mubr.msk.f32.mxu1 %vm308_vm0, %v256_v15  ;;  %p681_p6 = por %p680_p4, %p679_p3 }
  0x2b   : > { %295 = vperm.xlu1 %671, %v265_v16   ;;  %290 = vperm.xlu0 %670, %v264_v17  }
  0x2c   : > { %p682_p7 = pnand %p681_p6, %p675_p2 }
  0x2d   : > { %597 = vmatmul.mubr.msk.f32.gmra.mrb[2].mxu0 %vm308_vm0, %v253_v18  ;;  %603 = vmatmul.mubr.msk.f32.gmra.mrb[2].mxu1 %vm308_vm0, %v257_v19 }
  0x2f   : > { %305 = vperm.xlu1 %671, %v267_v20   ;;  %300 = vperm.xlu0 %670, %v266_v21  }
  0xa1   : > { %v281_v22 = vpop.permute.xlu1 %280  ;;  %v271_v23 = vpop.permute.xlu0 %270 }
  0xa6   : > { %v286_v24 = vpop.permute.xlu1 %285  ;;  %v276_v25 = vpop.permute.xlu0 %275 }
  0xaa   : > { %v296_v26 = vpop.permute.xlu1 %295  ;;  %v291_v27 = vpop.permute.xlu0 %290 }
  0xae   : > { %v306_v36 = vpop.permute.xlu1 %305  ;;  %v301_v37 = vpop.permute.xlu0 %300 }
  0xfc   : > { %v595_v28 = vpop.f32.mrb[0].mxu0  ;;  %v601_v29 = vpop.f32.mrb[0].mxu1 }
  0xfd   : > { %v405_v30 = vadd.f32 %v595_v28, %v276_v25  ;;  %v425_v31 = vadd.f32 %v601_v29, %v296_v26  ;;  %v399_v32 = vpop.f32.mrb[1].mxu0  ;;  %v419_v33 = vpop.f32.mrb[1].mxu1 }
  0xfe   : > { %v400_v34 = vadd.f32 %v399_v32, %v271_v23  ;;  %v420_v35 = vadd.f32 %v419_v33, %v291_v27 }
  0xff   : > { %439 = vst [vmem:[%s241_s10 + $0x8] sm:$0xff] %v405_v30  ;;  %443 = vst [vmem:[%s241_s10 + $0x28] sm:$0xff] %v425_v31 }
 0x100   : > { %438 = vst [vmem:[%s241_s10] sm:$0xff] %v400_v34  ;;  %442 = vst [vmem:[%s241_s10 + $0x20] sm:$0xff] %v420_v35  ;;  %v598_v38 = vpop.f32.mrb[2].mxu0  ;;  %v604_v39 = vpop.f32.mrb[2].mxu1 }
 0x101   : > { %v415_v40 = vadd.f32 %v598_v38, %v286_v24  ;;  %v435_v41 = vadd.f32 %v604_v39, %v306_v36  ;;  %v409_v42 = vpop.f32.mrb[3].mxu0  ;;  %v429_v43 = vpop.f32.mrb[3].mxu1 }
 0x102   : > { %v410_v44 = vadd.f32 %v409_v42, %v281_v22  ;;  %v430_v45 = vadd.f32 %v429_v43, %v301_v37 }
 0x103   : > { %441 = vst [vmem:[%s241_s10 + $0x18] sm:$0xff] %v415_v40  ;;  %445 = vst [vmem:[%s241_s10 + $0x38] sm:$0xff] %v435_v41 }
 0x104   : > { %440 = vst [vmem:[%s241_s10 + $0x10] sm:$0xff] %v410_v44  ;;  %444 = vst [vmem:[%s241_s10 + $0x30] sm:$0xff] %v430_v45 }
 0x105   : > { %685 = shalt.err (!%p682_p7)
}
 0x106   : > { %s686_s30 = scalar_lea.hbm %s908_s21, 1024  ;;  %s690_s7 = scalar_lea.hbm %s960_s3, 2048 }
 0x107   : > { %p687_p8 = scmp.ne.s32.totalorder %s908_s21, %s686_s30  ;;  %p691_p13 = scmp.lt.u32.totalorder %s908_s21, %s960_s3 }
 0x108   : > { %p692_p0 = scmp.lt.u32.totalorder %s690_s7, %s686_s30  ;;  %p694_p2 = scmp.lt.u32.totalorder %s686_s30, %s908_s21 }
 0x109   : > { %p688_p11 = pnand %p687_p8, %p816_p5 }
 0x10a   : > { %p693_p1 = por %p692_p0, %p691_p13 }
 0x10b   : > { %p689_p12 = pneg %p688_p11 }
 0x10c   : > { %p695_p3 = por %p694_p2, %p693_p1 }
 0x10e   : > { %p696_p4 = pnand %p695_p3, %p689_p12 }
 0x110   : > { %699 = shalt.err (!%p696_p4)
}
 0x111   : > { %s754_s10 = smov 128   ;;  %s755_s18 = smov 256  }
 0x112   : > { %s756_s19 = smov 8  }
 0x113   : > { %611 = dma.vmem_to_hbm [thread:$0]  (%p816_p5), %s903_s11, 1024, %s908_s21, %s447_s23, %s754_s10, %s755_s18, %s756_s19  }
 0x114 PF: > { %s477_s15 = sand.u32 1, %s730_s12   ;;  %p614_p6 = pnand %p561_p10, %p827_p9 }
 0x115   : > { %s478_s26 = scalar_lea.sflag [#allocation4], %s477_s15 }
 0x116   : > { %725 = dma.done.wait (!%p614_p6), %s478_s26, 1024  }
 0x117   : > { %727 = vsyncadd (!%p614_p6), %s478_s26, 4294966272  ;;  %s16_s17 = sadd.s32 1, %s750_s17   ;;  %s963_s12 = smov %s734_s13 }
 0x118   : > { %p13_p7 = scmp.ge.s32.totalorder %s16_s17, 4   ;;  %s964_s13 = smov %s738_s14 }
 0x119   : > { %s965_s14 = smov %s825_s24  ;;  %s966_s15 = smov %s746_s16 }
 0x11a   : > { %s967_s16 = smov %s969_s20  ;;  %15 = sbr.rel (!%p13_p7) target bundleno = 4 (0x4), region = 113 }
 0x121   :  { %483 = vsyncpa [#allocation4], 1 }
 0x122   :  { %485 = vsyncpa [#allocation4 + $0x1], 1 }

</bundles_post_ra>
